<compile_context>
chip_gen: v6e
topology: v6e:2x2x1
jax: 0.10.0
libtpu: 0.0.40
codegen_flags: <defaults>
</compile_context>

<pallas_src>
import functools
import math

import jax
import jax.numpy as jnp
from jax.experimental import pallas as pl
from jax.experimental.pallas import tpu as pltpu


# ---------------------------------------------------------------------------
# helpers
# ---------------------------------------------------------------------------
def _round_up(x: int, m: int) -> int:
    return ((x + m - 1) // m) * m


def _choose_groups(num_groups: int, C: int, target_rows: int, max_groups: int) -> int:
    """(n,l) groups per grid step.  Keeps G*C a multiple of 8 (sublane tiling)
    and the grid length >= 2 so both v7x TensorCores get work."""
    g_align = 8 // math.gcd(8, C)
    G = max(1, target_rows // max(C, 1))
    G = min(G, max_groups)
    G = max(g_align, (G // g_align) * g_align)
    if num_groups >= 2 * g_align:
        cap = (num_groups // 2 // g_align) * g_align
        G = min(G, max(g_align, cap))
    return G


def build_apow(supports_padded, order):
    """supports_padded:(S, Vp, Vp) f32 -> (Vp, P*Vp), P = S*order.

    Column-block order matches the PyTorch h channel order (block p' =
    s*order + (k-1) holds A_s^k); the identity/x block is NOT materialized --
    the kernel reuses the x tile directly."""
    S = supports_padded.shape[0]
    mats = []
    for s in range(S):
        a = supports_padded[s]
        p = a
        mats.append(p)
        for _ in range(order - 1):
            p = p @ a                      # (x@A)@A == x@(A@A)
            mats.append(p)
    return jnp.concatenate(mats, axis=1)


# ---------------------------------------------------------------------------
# fused Pallas kernel
# ---------------------------------------------------------------------------
def gcn_fused_kernel(x_ref, apow_ref, w_ref, b_ref, o_ref):
    # x_ref   : (G*C, Vp)          row tile, rows = (group, channel), lanes = node
    # apow_ref: (Vp, P*Vp)         resident adjacency powers
    # w_ref   : (Op, (P+1)*C)      resident 1x1-conv weight (x-block first)
    # b_ref   : (Op, 1)            resident bias (f32)
    # o_ref   : (G, Op, Vp)        output tile, lanes = node (lane-dense)
    G = o_ref.shape[0]
    GC, Vp = x_ref.shape
    C = GC // G
    P = apow_ref.shape[1] // Vp

    x_tile = x_ref[...]                                            # bf16
    # ---- stage 1: all graph-propagation powers in ONE wide MXU matmul ----
    h = jnp.dot(x_tile, apow_ref[...], preferred_element_type=jnp.float32)
    h = h.astype(x_tile.dtype)                                     # (G*C, P*Vp)

    w2 = w_ref[...]
    b = b_ref[...]                                                 # (Op, 1) f32

    # ---- stage 2: 1x1 conv per (n,l) group, nodes stay in lanes ----------
    for g in range(G):
        r0 = g * C
        parts = [x_tile[r0:r0 + C, :]]                             # identity block
        for p in range(P):
            parts.append(h[r0:r0 + C, p * Vp:(p + 1) * Vp])        # 128-aligned lane slice
        hr = jnp.concatenate(parts, axis=0)                        # ((P+1)*C, Vp)
        acc = jnp.dot(w2, hr, preferred_element_type=jnp.float32)  # (Op, Vp)
        o_ref[g, :, :] = (acc + b).astype(o_ref.dtype)


# ---------------------------------------------------------------------------
# wrapper
# ---------------------------------------------------------------------------
def gcn_forward(x, supports, weight, bias, order=2, *,
                compute_dtype=jnp.bfloat16,
                out_store_dtype=jnp.bfloat16,
                target_rows=1024, max_groups=64):
    """Equivalent of gcn.forward(x, support) at inference time.

    x:        (N, C, V, L) f32      supports: (S, V, V) f32
    weight:   (Cout, (S*order+1)*C, 1, 1)     bias: (Cout,)
    returns   (N, Cout, V, L) f32
    """
    N, C, V, L = x.shape
    S = supports.shape[0]
    P = S * order
    O = weight.shape[0]
    assert weight.shape[1] == (P + 1) * C

    Vp = _round_up(V, 128)            # lane-dense node axis
    Op = _round_up(O, 8)              # sublane-aligned output channels

    # adjacency powers: pad -> power -> concat (f32), cast once to compute dtype
    sup = jnp.pad(supports.astype(jnp.float32),
                  ((0, 0), (0, Vp - V), (0, Vp - V)))
    apow = build_apow(sup, order).astype(compute_dtype)            # (Vp, P*Vp)

    # x -> rows=(n,l,c), lanes=v ; cast to bf16 BEFORE the transpose
    xr = jnp.transpose(x.astype(compute_dtype), (0, 3, 1, 2))      # (N,L,C,V)
    xr = jnp.pad(xr, ((0, 0), (0, 0), (0, 0), (0, Vp - V)))
    x_rows = xr.reshape(N * L * C, Vp)

    NG = N * L
    G = _choose_groups(NG, C, target_rows, max_groups)
    NGp = _round_up(NG, G)
    if NGp != NG:
        x_rows = jnp.pad(x_rows, ((0, (NGp - NG) * C), (0, 0)))

    w2 = weight.reshape(O, (P + 1) * C)
    w2 = jnp.pad(w2, ((0, Op - O), (0, 0))).astype(compute_dtype)  # (Op, (P+1)C)
    b2 = jnp.pad(bias.astype(jnp.float32), (0, Op - O)).reshape(Op, 1)

    csize = jnp.dtype(compute_dtype).itemsize
    cost = pl.CostEstimate(
        flops=2 * NGp * C * Vp * P * Vp + 2 * NGp * (P + 1) * C * Op * Vp,
        transcendentals=0,
        bytes_accessed=int((x_rows.size + apow.size + w2.size) * csize
                           + NGp * Op * Vp * jnp.dtype(out_store_dtype).itemsize
                           + Op * 4),
    )

    out = pl.pallas_call(
        gcn_fused_kernel,
        out_shape=jax.ShapeDtypeStruct((NGp, Op, Vp), out_store_dtype),
        grid=(NGp // G,),
        in_specs=[
            pl.BlockSpec((G * C, Vp), lambda i: (i, 0)),           # x row tile
            pl.BlockSpec((Vp, P * Vp), lambda i: (0, 0)),          # resident apow
            pl.BlockSpec((Op, (P + 1) * C), lambda i: (0, 0)),     # resident W2
            pl.BlockSpec((Op, 1), lambda i: (0, 0)),               # resident bias
        ],
        out_specs=pl.BlockSpec((G, Op, Vp), lambda i: (i, 0, 0)),
        compiler_params=pltpu.CompilerParams(
            dimension_semantics=("parallel",),
            vmem_limit_bytes=48 * 1024 * 1024,   # fits 64-MiB v7x, ample on v5e/v6e
        ),
        cost_estimate=cost,
    )(x_rows, apow, w2, b2)

    out = out[:NG, :O, :V].reshape(N, L, O, V)
    return jnp.transpose(out, (0, 2, 3, 1)).astype(jnp.float32)    # (N, O, V, L)


# ---------------------------------------------------------------------------
# pure-JAX reference (mirrors the PyTorch forward) for the correctness check
# ---------------------------------------------------------------------------
def gcn_reference(x, supports, weight, bias, order=2):
    hp = jax.lax.Precision.HIGHEST
    out = [x]
    for s in range(supports.shape[0]):
        a = supports[s]
        x1 = jnp.einsum('ncvl,vw->ncwl', x, a, precision=hp)
        out.append(x1)
        for _ in range(2, order + 1):
            x2 = jnp.einsum('ncvl,vw->ncwl', x1, a, precision=hp)
            out.append(x2)
            x1 = x2
    h = jnp.concatenate(out, axis=1)
    w2 = weight.reshape(weight.shape[0], -1)
    ho = jnp.einsum('ncvl,oc->novl', h, w2, precision=hp)
    return ho + bias[None, :, None, None]


# ---------------------------------------------------------------------------
if __name__ == "__main__":
    key = jax.random.PRNGKey(0)
    kx, ks, kw, kb = jax.random.split(key, 4)

    # small shapes consistent with the module
    N, C, V, L = 2, 4, 8, 12            # batch, channels, nodes, seq
    support_len, order = 3, 2
    c_out = 8
    c_in_total = (order * support_len + 1) * C

    x = jax.random.normal(kx, (N, C, V, L), dtype=jnp.float32)
    supports = jax.random.normal(ks, (support_len, V, V), dtype=jnp.float32) * 0.3
    weight = jax.random.normal(kw, (c_out, c_in_total, 1, 1), dtype=jnp.float32) * 0.1
    bias = jax.random.normal(kb, (c_out,), dtype=jnp.float32) * 0.1

    fwd = jax.jit(functools.partial(gcn_forward, order=order))
    out = jax.block_until_ready(fwd(x, supports, weight, bias))

    ref = gcn_reference(x, supports, weight, bias, order=order)
    assert out.shape == (N, c_out, V, L)
    err = float(jnp.max(jnp.abs(out - ref)))
    # bf16 compute/store with f32 MXU accumulation -> loose tolerance vs f32 ref
    assert jnp.allclose(out, ref, atol=7e-2, rtol=7e-2), (
        f"mismatch vs reference (max abs err = {err})")

    print("KERNEL_OK")
</pallas_src>

<mosaic_0001>
module attributes {stable_mosaic.version = 11 : i64} {
  func.func @gcn_fused_kernel(%arg0: i32, %arg1: memref<48x128xbf16, #tpu.memory_space<vmem>>, %arg2: memref<128x768xbf16, #tpu.memory_space<vmem>>, %arg3: memref<8x28xbf16, #tpu.memory_space<vmem>>, %arg4: memref<8x1xf32, #tpu.memory_space<vmem>>, %arg5: memref<12x8x128xbf16, #tpu.memory_space<vmem>>) attributes {dimension_semantics = [#tpu.dimension_semantics<parallel>], iteration_bounds = array<i64: 2>, scalar_prefetch = 0 : i64, scratch_operands = 0 : i64, tpu.core_type = #tpu.core_type<tc>, window_params = [{transform_indices = @transform_0, window_bounds = array<i64: 48, 128>}, {pipeline_mode = #tpu.pipeline_mode<synchronous>, transform_indices = @transform_1, window_bounds = array<i64: 128, 768>}, {pipeline_mode = #tpu.pipeline_mode<synchronous>, transform_indices = @transform_2, window_bounds = array<i64: 8, 28>}, {pipeline_mode = #tpu.pipeline_mode<synchronous>, transform_indices = @transform_3, window_bounds = array<i64: 8, 1>}, {transform_indices = @transform_4, window_bounds = array<i64: 12, 8, 128>}]} {
    %c0 = arith.constant 0 : index
    %c0_0 = arith.constant 0 : index
    %0 = vector.load %arg1[%c0, %c0_0] : memref<48x128xbf16, #tpu.memory_space<vmem>>, vector<48x128xbf16>
    %c0_1 = arith.constant 0 : index
    %c0_2 = arith.constant 0 : index
    %1 = vector.load %arg2[%c0_1, %c0_2] : memref<128x768xbf16, #tpu.memory_space<vmem>>, vector<128x768xbf16>
    %cst = arith.constant dense<0.000000e+00> : vector<48x768xf32>
    %2 = tpu.matmul %0, %1, %cst {dimension_numbers = #tpu.dot_dimension_numbers<[1], [0], [0], [1], [0, 0, 1, 1], [], []>} : vector<48x128xbf16>, vector<128x768xbf16>, vector<48x768xf32> -> vector<48x768xf32>
    %3 = arith.truncf %2 : vector<48x768xf32> to vector<48x768xbf16>
    %c0_3 = arith.constant 0 : index
    %c0_4 = arith.constant 0 : index
    %4 = vector.load %arg3[%c0_3, %c0_4] : memref<8x28xbf16, #tpu.memory_space<vmem>>, vector<8x28xbf16>
    %c0_5 = arith.constant 0 : index
    %c0_6 = arith.constant 0 : index
    %5 = vector.load %arg4[%c0_5, %c0_6] : memref<8x1xf32, #tpu.memory_space<vmem>>, vector<8x1xf32>
    %6 = vector.extract_strided_slice %0 {offsets = [0, 0], sizes = [4, 128], strides = [1, 1]} : vector<48x128xbf16> to vector<4x128xbf16>
    %7 = vector.extract_strided_slice %3 {offsets = [0, 0], sizes = [4, 128], strides = [1, 1]} : vector<48x768xbf16> to vector<4x128xbf16>
    %8 = vector.extract_strided_slice %3 {offsets = [0, 128], sizes = [4, 128], strides = [1, 1]} : vector<48x768xbf16> to vector<4x128xbf16>
    %9 = vector.extract_strided_slice %3 {offsets = [0, 256], sizes = [4, 128], strides = [1, 1]} : vector<48x768xbf16> to vector<4x128xbf16>
    %10 = vector.extract_strided_slice %3 {offsets = [0, 384], sizes = [4, 128], strides = [1, 1]} : vector<48x768xbf16> to vector<4x128xbf16>
    %11 = vector.extract_strided_slice %3 {offsets = [0, 512], sizes = [4, 128], strides = [1, 1]} : vector<48x768xbf16> to vector<4x128xbf16>
    %12 = vector.extract_strided_slice %3 {offsets = [0, 640], sizes = [4, 128], strides = [1, 1]} : vector<48x768xbf16> to vector<4x128xbf16>
    %13 = tpu.concatenate %6, %7, %8, %9, %10, %11, %12 in 0 : vector<4x128xbf16>, vector<4x128xbf16>, vector<4x128xbf16>, vector<4x128xbf16>, vector<4x128xbf16>, vector<4x128xbf16>, vector<4x128xbf16> -> vector<28x128xbf16>
    %cst_7 = arith.constant dense<0.000000e+00> : vector<8x128xf32>
    %14 = tpu.matmul %4, %13, %cst_7 {dimension_numbers = #tpu.dot_dimension_numbers<[1], [0], [0], [1], [0, 0, 1, 1], [], []>} : vector<8x28xbf16>, vector<28x128xbf16>, vector<8x128xf32> -> vector<8x128xf32>
    %15 = vector.broadcast %5 : vector<8x1xf32> to vector<8x128xf32>
    %16 = arith.addf %14, %15 : vector<8x128xf32>
    %17 = arith.truncf %16 : vector<8x128xf32> to vector<8x128xbf16>
    %c0_8 = arith.constant 0 : index
    %c0_9 = arith.constant 0 : index
    %c0_10 = arith.constant 0 : index
    %18 = vector.load %arg5[%c0_8, %c0_9, %c0_10] : memref<12x8x128xbf16, #tpu.memory_space<vmem>>, vector<1x8x128xbf16>
    %19 = vector.shape_cast %18 : vector<1x8x128xbf16> to vector<8x128xbf16>
    %20 = vector.shape_cast %17 : vector<8x128xbf16> to vector<1x8x128xbf16>
    tpu.vector_store %arg5[%c0_8, %c0_9, %c0_10], %20 {strides = array<i32>} : memref<12x8x128xbf16, #tpu.memory_space<vmem>>, vector<1x8x128xbf16>,
    %21 = vector.extract_strided_slice %0 {offsets = [4, 0], sizes = [4, 128], strides = [1, 1]} : vector<48x128xbf16> to vector<4x128xbf16>
    %22 = vector.extract_strided_slice %3 {offsets = [4, 0], sizes = [4, 128], strides = [1, 1]} : vector<48x768xbf16> to vector<4x128xbf16>
    %23 = vector.extract_strided_slice %3 {offsets = [4, 128], sizes = [4, 128], strides = [1, 1]} : vector<48x768xbf16> to vector<4x128xbf16>
    %24 = vector.extract_strided_slice %3 {offsets = [4, 256], sizes = [4, 128], strides = [1, 1]} : vector<48x768xbf16> to vector<4x128xbf16>
    %25 = vector.extract_strided_slice %3 {offsets = [4, 384], sizes = [4, 128], strides = [1, 1]} : vector<48x768xbf16> to vector<4x128xbf16>
    %26 = vector.extract_strided_slice %3 {offsets = [4, 512], sizes = [4, 128], strides = [1, 1]} : vector<48x768xbf16> to vector<4x128xbf16>
    %27 = vector.extract_strided_slice %3 {offsets = [4, 640], sizes = [4, 128], strides = [1, 1]} : vector<48x768xbf16> to vector<4x128xbf16>
    %28 = tpu.concatenate %21, %22, %23, %24, %25, %26, %27 in 0 : vector<4x128xbf16>, vector<4x128xbf16>, vector<4x128xbf16>, vector<4x128xbf16>, vector<4x128xbf16>, vector<4x128xbf16>, vector<4x128xbf16> -> vector<28x128xbf16>
    %cst_11 = arith.constant dense<0.000000e+00> : vector<8x128xf32>
    %29 = tpu.matmul %4, %28, %cst_11 {dimension_numbers = #tpu.dot_dimension_numbers<[1], [0], [0], [1], [0, 0, 1, 1], [], []>} : vector<8x28xbf16>, vector<28x128xbf16>, vector<8x128xf32> -> vector<8x128xf32>
    %30 = vector.broadcast %5 : vector<8x1xf32> to vector<8x128xf32>
    %31 = arith.addf %29, %30 : vector<8x128xf32>
    %32 = arith.truncf %31 : vector<8x128xf32> to vector<8x128xbf16>
    %c1 = arith.constant 1 : index
    %c0_12 = arith.constant 0 : index
    %c0_13 = arith.constant 0 : index
    %33 = vector.load %arg5[%c1, %c0_12, %c0_13] : memref<12x8x128xbf16, #tpu.memory_space<vmem>>, vector<1x8x128xbf16>
    %34 = vector.shape_cast %33 : vector<1x8x128xbf16> to vector<8x128xbf16>
    %35 = vector.shape_cast %32 : vector<8x128xbf16> to vector<1x8x128xbf16>
    tpu.vector_store %arg5[%c1, %c0_12, %c0_13], %35 {strides = array<i32>} : memref<12x8x128xbf16, #tpu.memory_space<vmem>>, vector<1x8x128xbf16>,
    %36 = vector.extract_strided_slice %0 {offsets = [8, 0], sizes = [4, 128], strides = [1, 1]} : vector<48x128xbf16> to vector<4x128xbf16>
    %37 = vector.extract_strided_slice %3 {offsets = [8, 0], sizes = [4, 128], strides = [1, 1]} : vector<48x768xbf16> to vector<4x128xbf16>
    %38 = vector.extract_strided_slice %3 {offsets = [8, 128], sizes = [4, 128], strides = [1, 1]} : vector<48x768xbf16> to vector<4x128xbf16>
    %39 = vector.extract_strided_slice %3 {offsets = [8, 256], sizes = [4, 128], strides = [1, 1]} : vector<48x768xbf16> to vector<4x128xbf16>
    %40 = vector.extract_strided_slice %3 {offsets = [8, 384], sizes = [4, 128], strides = [1, 1]} : vector<48x768xbf16> to vector<4x128xbf16>
    %41 = vector.extract_strided_slice %3 {offsets = [8, 512], sizes = [4, 128], strides = [1, 1]} : vector<48x768xbf16> to vector<4x128xbf16>
    %42 = vector.extract_strided_slice %3 {offsets = [8, 640], sizes = [4, 128], strides = [1, 1]} : vector<48x768xbf16> to vector<4x128xbf16>
    %43 = tpu.concatenate %36, %37, %38, %39, %40, %41, %42 in 0 : vector<4x128xbf16>, vector<4x128xbf16>, vector<4x128xbf16>, vector<4x128xbf16>, vector<4x128xbf16>, vector<4x128xbf16>, vector<4x128xbf16> -> vector<28x128xbf16>
    %cst_14 = arith.constant dense<0.000000e+00> : vector<8x128xf32>
    %44 = tpu.matmul %4, %43, %cst_14 {dimension_numbers = #tpu.dot_dimension_numbers<[1], [0], [0], [1], [0, 0, 1, 1], [], []>} : vector<8x28xbf16>, vector<28x128xbf16>, vector<8x128xf32> -> vector<8x128xf32>
    %45 = vector.broadcast %5 : vector<8x1xf32> to vector<8x128xf32>
    %46 = arith.addf %44, %45 : vector<8x128xf32>
    %47 = arith.truncf %46 : vector<8x128xf32> to vector<8x128xbf16>
    %c2 = arith.constant 2 : index
    %c0_15 = arith.constant 0 : index
    %c0_16 = arith.constant 0 : index
    %48 = vector.load %arg5[%c2, %c0_15, %c0_16] : memref<12x8x128xbf16, #tpu.memory_space<vmem>>, vector<1x8x128xbf16>
    %49 = vector.shape_cast %48 : vector<1x8x128xbf16> to vector<8x128xbf16>
    %50 = vector.shape_cast %47 : vector<8x128xbf16> to vector<1x8x128xbf16>
    tpu.vector_store %arg5[%c2, %c0_15, %c0_16], %50 {strides = array<i32>} : memref<12x8x128xbf16, #tpu.memory_space<vmem>>, vector<1x8x128xbf16>,
    %51 = vector.extract_strided_slice %0 {offsets = [12, 0], sizes = [4, 128], strides = [1, 1]} : vector<48x128xbf16> to vector<4x128xbf16>
    %52 = vector.extract_strided_slice %3 {offsets = [12, 0], sizes = [4, 128], strides = [1, 1]} : vector<48x768xbf16> to vector<4x128xbf16>
    %53 = vector.extract_strided_slice %3 {offsets = [12, 128], sizes = [4, 128], strides = [1, 1]} : vector<48x768xbf16> to vector<4x128xbf16>
    %54 = vector.extract_strided_slice %3 {offsets = [12, 256], sizes = [4, 128], strides = [1, 1]} : vector<48x768xbf16> to vector<4x128xbf16>
    %55 = vector.extract_strided_slice %3 {offsets = [12, 384], sizes = [4, 128], strides = [1, 1]} : vector<48x768xbf16> to vector<4x128xbf16>
    %56 = vector.extract_strided_slice %3 {offsets = [12, 512], sizes = [4, 128], strides = [1, 1]} : vector<48x768xbf16> to vector<4x128xbf16>
    %57 = vector.extract_strided_slice %3 {offsets = [12, 640], sizes = [4, 128], strides = [1, 1]} : vector<48x768xbf16> to vector<4x128xbf16>
    %58 = tpu.concatenate %51, %52, %53, %54, %55, %56, %57 in 0 : vector<4x128xbf16>, vector<4x128xbf16>, vector<4x128xbf16>, vector<4x128xbf16>, vector<4x128xbf16>, vector<4x128xbf16>, vector<4x128xbf16> -> vector<28x128xbf16>
    %cst_17 = arith.constant dense<0.000000e+00> : vector<8x128xf32>
    %59 = tpu.matmul %4, %58, %cst_17 {dimension_numbers = #tpu.dot_dimension_numbers<[1], [0], [0], [1], [0, 0, 1, 1], [], []>} : vector<8x28xbf16>, vector<28x128xbf16>, vector<8x128xf32> -> vector<8x128xf32>
    %60 = vector.broadcast %5 : vector<8x1xf32> to vector<8x128xf32>
    %61 = arith.addf %59, %60 : vector<8x128xf32>
    %62 = arith.truncf %61 : vector<8x128xf32> to vector<8x128xbf16>
    %c3 = arith.constant 3 : index
    %c0_18 = arith.constant 0 : index
    %c0_19 = arith.constant 0 : index
    %63 = vector.load %arg5[%c3, %c0_18, %c0_19] : memref<12x8x128xbf16, #tpu.memory_space<vmem>>, vector<1x8x128xbf16>
    %64 = vector.shape_cast %63 : vector<1x8x128xbf16> to vector<8x128xbf16>
    %65 = vector.shape_cast %62 : vector<8x128xbf16> to vector<1x8x128xbf16>
    tpu.vector_store %arg5[%c3, %c0_18, %c0_19], %65 {strides = array<i32>} : memref<12x8x128xbf16, #tpu.memory_space<vmem>>, vector<1x8x128xbf16>,
    %66 = vector.extract_strided_slice %0 {offsets = [16, 0], sizes = [4, 128], strides = [1, 1]} : vector<48x128xbf16> to vector<4x128xbf16>
    %67 = vector.extract_strided_slice %3 {offsets = [16, 0], sizes = [4, 128], strides = [1, 1]} : vector<48x768xbf16> to vector<4x128xbf16>
    %68 = vector.extract_strided_slice %3 {offsets = [16, 128], sizes = [4, 128], strides = [1, 1]} : vector<48x768xbf16> to vector<4x128xbf16>
    %69 = vector.extract_strided_slice %3 {offsets = [16, 256], sizes = [4, 128], strides = [1, 1]} : vector<48x768xbf16> to vector<4x128xbf16>
    %70 = vector.extract_strided_slice %3 {offsets = [16, 384], sizes = [4, 128], strides = [1, 1]} : vector<48x768xbf16> to vector<4x128xbf16>
    %71 = vector.extract_strided_slice %3 {offsets = [16, 512], sizes = [4, 128], strides = [1, 1]} : vector<48x768xbf16> to vector<4x128xbf16>
    %72 = vector.extract_strided_slice %3 {offsets = [16, 640], sizes = [4, 128], strides = [1, 1]} : vector<48x768xbf16> to vector<4x128xbf16>
    %73 = tpu.concatenate %66, %67, %68, %69, %70, %71, %72 in 0 : vector<4x128xbf16>, vector<4x128xbf16>, vector<4x128xbf16>, vector<4x128xbf16>, vector<4x128xbf16>, vector<4x128xbf16>, vector<4x128xbf16> -> vector<28x128xbf16>
    %cst_20 = arith.constant dense<0.000000e+00> : vector<8x128xf32>
    %74 = tpu.matmul %4, %73, %cst_20 {dimension_numbers = #tpu.dot_dimension_numbers<[1], [0], [0], [1], [0, 0, 1, 1], [], []>} : vector<8x28xbf16>, vector<28x128xbf16>, vector<8x128xf32> -> vector<8x128xf32>
    %75 = vector.broadcast %5 : vector<8x1xf32> to vector<8x128xf32>
    %76 = arith.addf %74, %75 : vector<8x128xf32>
    %77 = arith.truncf %76 : vector<8x128xf32> to vector<8x128xbf16>
    %c4 = arith.constant 4 : index
    %c0_21 = arith.constant 0 : index
    %c0_22 = arith.constant 0 : index
    %78 = vector.load %arg5[%c4, %c0_21, %c0_22] : memref<12x8x128xbf16, #tpu.memory_space<vmem>>, vector<1x8x128xbf16>
    %79 = vector.shape_cast %78 : vector<1x8x128xbf16> to vector<8x128xbf16>
    %80 = vector.shape_cast %77 : vector<8x128xbf16> to vector<1x8x128xbf16>
    tpu.vector_store %arg5[%c4, %c0_21, %c0_22], %80 {strides = array<i32>} : memref<12x8x128xbf16, #tpu.memory_space<vmem>>, vector<1x8x128xbf16>,
    %81 = vector.extract_strided_slice %0 {offsets = [20, 0], sizes = [4, 128], strides = [1, 1]} : vector<48x128xbf16> to vector<4x128xbf16>
    %82 = vector.extract_strided_slice %3 {offsets = [20, 0], sizes = [4, 128], strides = [1, 1]} : vector<48x768xbf16> to vector<4x128xbf16>
    %83 = vector.extract_strided_slice %3 {offsets = [20, 128], sizes = [4, 128], strides = [1, 1]} : vector<48x768xbf16> to vector<4x128xbf16>
    %84 = vector.extract_strided_slice %3 {offsets = [20, 256], sizes = [4, 128], strides = [1, 1]} : vector<48x768xbf16> to vector<4x128xbf16>
    %85 = vector.extract_strided_slice %3 {offsets = [20, 384], sizes = [4, 128], strides = [1, 1]} : vector<48x768xbf16> to vector<4x128xbf16>
    %86 = vector.extract_strided_slice %3 {offsets = [20, 512], sizes = [4, 128], strides = [1, 1]} : vector<48x768xbf16> to vector<4x128xbf16>
    %87 = vector.extract_strided_slice %3 {offsets = [20, 640], sizes = [4, 128], strides = [1, 1]} : vector<48x768xbf16> to vector<4x128xbf16>
    %88 = tpu.concatenate %81, %82, %83, %84, %85, %86, %87 in 0 : vector<4x128xbf16>, vector<4x128xbf16>, vector<4x128xbf16>, vector<4x128xbf16>, vector<4x128xbf16>, vector<4x128xbf16>, vector<4x128xbf16> -> vector<28x128xbf16>
    %cst_23 = arith.constant dense<0.000000e+00> : vector<8x128xf32>
    %89 = tpu.matmul %4, %88, %cst_23 {dimension_numbers = #tpu.dot_dimension_numbers<[1], [0], [0], [1], [0, 0, 1, 1], [], []>} : vector<8x28xbf16>, vector<28x128xbf16>, vector<8x128xf32> -> vector<8x128xf32>
    %90 = vector.broadcast %5 : vector<8x1xf32> to vector<8x128xf32>
    %91 = arith.addf %89, %90 : vector<8x128xf32>
    %92 = arith.truncf %91 : vector<8x128xf32> to vector<8x128xbf16>
    %c5 = arith.constant 5 : index
    %c0_24 = arith.constant 0 : index
    %c0_25 = arith.constant 0 : index
    %93 = vector.load %arg5[%c5, %c0_24, %c0_25] : memref<12x8x128xbf16, #tpu.memory_space<vmem>>, vector<1x8x128xbf16>
    %94 = vector.shape_cast %93 : vector<1x8x128xbf16> to vector<8x128xbf16>
    %95 = vector.shape_cast %92 : vector<8x128xbf16> to vector<1x8x128xbf16>
    tpu.vector_store %arg5[%c5, %c0_24, %c0_25], %95 {strides = array<i32>} : memref<12x8x128xbf16, #tpu.memory_space<vmem>>, vector<1x8x128xbf16>,
    %96 = vector.extract_strided_slice %0 {offsets = [24, 0], sizes = [4, 128], strides = [1, 1]} : vector<48x128xbf16> to vector<4x128xbf16>
    %97 = vector.extract_strided_slice %3 {offsets = [24, 0], sizes = [4, 128], strides = [1, 1]} : vector<48x768xbf16> to vector<4x128xbf16>
    %98 = vector.extract_strided_slice %3 {offsets = [24, 128], sizes = [4, 128], strides = [1, 1]} : vector<48x768xbf16> to vector<4x128xbf16>
    %99 = vector.extract_strided_slice %3 {offsets = [24, 256], sizes = [4, 128], strides = [1, 1]} : vector<48x768xbf16> to vector<4x128xbf16>
    %100 = vector.extract_strided_slice %3 {offsets = [24, 384], sizes = [4, 128], strides = [1, 1]} : vector<48x768xbf16> to vector<4x128xbf16>
    %101 = vector.extract_strided_slice %3 {offsets = [24, 512], sizes = [4, 128], strides = [1, 1]} : vector<48x768xbf16> to vector<4x128xbf16>
    %102 = vector.extract_strided_slice %3 {offsets = [24, 640], sizes = [4, 128], strides = [1, 1]} : vector<48x768xbf16> to vector<4x128xbf16>
    %103 = tpu.concatenate %96, %97, %98, %99, %100, %101, %102 in 0 : vector<4x128xbf16>, vector<4x128xbf16>, vector<4x128xbf16>, vector<4x128xbf16>, vector<4x128xbf16>, vector<4x128xbf16>, vector<4x128xbf16> -> vector<28x128xbf16>
    %cst_26 = arith.constant dense<0.000000e+00> : vector<8x128xf32>
    %104 = tpu.matmul %4, %103, %cst_26 {dimension_numbers = #tpu.dot_dimension_numbers<[1], [0], [0], [1], [0, 0, 1, 1], [], []>} : vector<8x28xbf16>, vector<28x128xbf16>, vector<8x128xf32> -> vector<8x128xf32>
    %105 = vector.broadcast %5 : vector<8x1xf32> to vector<8x128xf32>
    %106 = arith.addf %104, %105 : vector<8x128xf32>
    %107 = arith.truncf %106 : vector<8x128xf32> to vector<8x128xbf16>
    %c6 = arith.constant 6 : index
    %c0_27 = arith.constant 0 : index
    %c0_28 = arith.constant 0 : index
    %108 = vector.load %arg5[%c6, %c0_27, %c0_28] : memref<12x8x128xbf16, #tpu.memory_space<vmem>>, vector<1x8x128xbf16>
    %109 = vector.shape_cast %108 : vector<1x8x128xbf16> to vector<8x128xbf16>
    %110 = vector.shape_cast %107 : vector<8x128xbf16> to vector<1x8x128xbf16>
    tpu.vector_store %arg5[%c6, %c0_27, %c0_28], %110 {strides = array<i32>} : memref<12x8x128xbf16, #tpu.memory_space<vmem>>, vector<1x8x128xbf16>,
    %111 = vector.extract_strided_slice %0 {offsets = [28, 0], sizes = [4, 128], strides = [1, 1]} : vector<48x128xbf16> to vector<4x128xbf16>
    %112 = vector.extract_strided_slice %3 {offsets = [28, 0], sizes = [4, 128], strides = [1, 1]} : vector<48x768xbf16> to vector<4x128xbf16>
    %113 = vector.extract_strided_slice %3 {offsets = [28, 128], sizes = [4, 128], strides = [1, 1]} : vector<48x768xbf16> to vector<4x128xbf16>
    %114 = vector.extract_strided_slice %3 {offsets = [28, 256], sizes = [4, 128], strides = [1, 1]} : vector<48x768xbf16> to vector<4x128xbf16>
    %115 = vector.extract_strided_slice %3 {offsets = [28, 384], sizes = [4, 128], strides = [1, 1]} : vector<48x768xbf16> to vector<4x128xbf16>
    %116 = vector.extract_strided_slice %3 {offsets = [28, 512], sizes = [4, 128], strides = [1, 1]} : vector<48x768xbf16> to vector<4x128xbf16>
    %117 = vector.extract_strided_slice %3 {offsets = [28, 640], sizes = [4, 128], strides = [1, 1]} : vector<48x768xbf16> to vector<4x128xbf16>
    %118 = tpu.concatenate %111, %112, %113, %114, %115, %116, %117 in 0 : vector<4x128xbf16>, vector<4x128xbf16>, vector<4x128xbf16>, vector<4x128xbf16>, vector<4x128xbf16>, vector<4x128xbf16>, vector<4x128xbf16> -> vector<28x128xbf16>
    %cst_29 = arith.constant dense<0.000000e+00> : vector<8x128xf32>
    %119 = tpu.matmul %4, %118, %cst_29 {dimension_numbers = #tpu.dot_dimension_numbers<[1], [0], [0], [1], [0, 0, 1, 1], [], []>} : vector<8x28xbf16>, vector<28x128xbf16>, vector<8x128xf32> -> vector<8x128xf32>
    %120 = vector.broadcast %5 : vector<8x1xf32> to vector<8x128xf32>
    %121 = arith.addf %119, %120 : vector<8x128xf32>
    %122 = arith.truncf %121 : vector<8x128xf32> to vector<8x128xbf16>
    %c7 = arith.constant 7 : index
    %c0_30 = arith.constant 0 : index
    %c0_31 = arith.constant 0 : index
    %123 = vector.load %arg5[%c7, %c0_30, %c0_31] : memref<12x8x128xbf16, #tpu.memory_space<vmem>>, vector<1x8x128xbf16>
    %124 = vector.shape_cast %123 : vector<1x8x128xbf16> to vector<8x128xbf16>
    %125 = vector.shape_cast %122 : vector<8x128xbf16> to vector<1x8x128xbf16>
    tpu.vector_store %arg5[%c7, %c0_30, %c0_31], %125 {strides = array<i32>} : memref<12x8x128xbf16, #tpu.memory_space<vmem>>, vector<1x8x128xbf16>,
    %126 = vector.extract_strided_slice %0 {offsets = [32, 0], sizes = [4, 128], strides = [1, 1]} : vector<48x128xbf16> to vector<4x128xbf16>
    %127 = vector.extract_strided_slice %3 {offsets = [32, 0], sizes = [4, 128], strides = [1, 1]} : vector<48x768xbf16> to vector<4x128xbf16>
    %128 = vector.extract_strided_slice %3 {offsets = [32, 128], sizes = [4, 128], strides = [1, 1]} : vector<48x768xbf16> to vector<4x128xbf16>
    %129 = vector.extract_strided_slice %3 {offsets = [32, 256], sizes = [4, 128], strides = [1, 1]} : vector<48x768xbf16> to vector<4x128xbf16>
    %130 = vector.extract_strided_slice %3 {offsets = [32, 384], sizes = [4, 128], strides = [1, 1]} : vector<48x768xbf16> to vector<4x128xbf16>
    %131 = vector.extract_strided_slice %3 {offsets = [32, 512], sizes = [4, 128], strides = [1, 1]} : vector<48x768xbf16> to vector<4x128xbf16>
    %132 = vector.extract_strided_slice %3 {offsets = [32, 640], sizes = [4, 128], strides = [1, 1]} : vector<48x768xbf16> to vector<4x128xbf16>
    %133 = tpu.concatenate %126, %127, %128, %129, %130, %131, %132 in 0 : vector<4x128xbf16>, vector<4x128xbf16>, vector<4x128xbf16>, vector<4x128xbf16>, vector<4x128xbf16>, vector<4x128xbf16>, vector<4x128xbf16> -> vector<28x128xbf16>
    %cst_32 = arith.constant dense<0.000000e+00> : vector<8x128xf32>
    %134 = tpu.matmul %4, %133, %cst_32 {dimension_numbers = #tpu.dot_dimension_numbers<[1], [0], [0], [1], [0, 0, 1, 1], [], []>} : vector<8x28xbf16>, vector<28x128xbf16>, vector<8x128xf32> -> vector<8x128xf32>
    %135 = vector.broadcast %5 : vector<8x1xf32> to vector<8x128xf32>
    %136 = arith.addf %134, %135 : vector<8x128xf32>
    %137 = arith.truncf %136 : vector<8x128xf32> to vector<8x128xbf16>
    %c8 = arith.constant 8 : index
    %c0_33 = arith.constant 0 : index
    %c0_34 = arith.constant 0 : index
    %138 = vector.load %arg5[%c8, %c0_33, %c0_34] : memref<12x8x128xbf16, #tpu.memory_space<vmem>>, vector<1x8x128xbf16>
    %139 = vector.shape_cast %138 : vector<1x8x128xbf16> to vector<8x128xbf16>
    %140 = vector.shape_cast %137 : vector<8x128xbf16> to vector<1x8x128xbf16>
    tpu.vector_store %arg5[%c8, %c0_33, %c0_34], %140 {strides = array<i32>} : memref<12x8x128xbf16, #tpu.memory_space<vmem>>, vector<1x8x128xbf16>,
    %141 = vector.extract_strided_slice %0 {offsets = [36, 0], sizes = [4, 128], strides = [1, 1]} : vector<48x128xbf16> to vector<4x128xbf16>
    %142 = vector.extract_strided_slice %3 {offsets = [36, 0], sizes = [4, 128], strides = [1, 1]} : vector<48x768xbf16> to vector<4x128xbf16>
    %143 = vector.extract_strided_slice %3 {offsets = [36, 128], sizes = [4, 128], strides = [1, 1]} : vector<48x768xbf16> to vector<4x128xbf16>
    %144 = vector.extract_strided_slice %3 {offsets = [36, 256], sizes = [4, 128], strides = [1, 1]} : vector<48x768xbf16> to vector<4x128xbf16>
    %145 = vector.extract_strided_slice %3 {offsets = [36, 384], sizes = [4, 128], strides = [1, 1]} : vector<48x768xbf16> to vector<4x128xbf16>
    %146 = vector.extract_strided_slice %3 {offsets = [36, 512], sizes = [4, 128], strides = [1, 1]} : vector<48x768xbf16> to vector<4x128xbf16>
    %147 = vector.extract_strided_slice %3 {offsets = [36, 640], sizes = [4, 128], strides = [1, 1]} : vector<48x768xbf16> to vector<4x128xbf16>
    %148 = tpu.concatenate %141, %142, %143, %144, %145, %146, %147 in 0 : vector<4x128xbf16>, vector<4x128xbf16>, vector<4x128xbf16>, vector<4x128xbf16>, vector<4x128xbf16>, vector<4x128xbf16>, vector<4x128xbf16> -> vector<28x128xbf16>
    %cst_35 = arith.constant dense<0.000000e+00> : vector<8x128xf32>
    %149 = tpu.matmul %4, %148, %cst_35 {dimension_numbers = #tpu.dot_dimension_numbers<[1], [0], [0], [1], [0, 0, 1, 1], [], []>} : vector<8x28xbf16>, vector<28x128xbf16>, vector<8x128xf32> -> vector<8x128xf32>
    %150 = vector.broadcast %5 : vector<8x1xf32> to vector<8x128xf32>
    %151 = arith.addf %149, %150 : vector<8x128xf32>
    %152 = arith.truncf %151 : vector<8x128xf32> to vector<8x128xbf16>
    %c9 = arith.constant 9 : index
    %c0_36 = arith.constant 0 : index
    %c0_37 = arith.constant 0 : index
    %153 = vector.load %arg5[%c9, %c0_36, %c0_37] : memref<12x8x128xbf16, #tpu.memory_space<vmem>>, vector<1x8x128xbf16>
    %154 = vector.shape_cast %153 : vector<1x8x128xbf16> to vector<8x128xbf16>
    %155 = vector.shape_cast %152 : vector<8x128xbf16> to vector<1x8x128xbf16>
    tpu.vector_store %arg5[%c9, %c0_36, %c0_37], %155 {strides = array<i32>} : memref<12x8x128xbf16, #tpu.memory_space<vmem>>, vector<1x8x128xbf16>,
    %156 = vector.extract_strided_slice %0 {offsets = [40, 0], sizes = [4, 128], strides = [1, 1]} : vector<48x128xbf16> to vector<4x128xbf16>
    %157 = vector.extract_strided_slice %3 {offsets = [40, 0], sizes = [4, 128], strides = [1, 1]} : vector<48x768xbf16> to vector<4x128xbf16>
    %158 = vector.extract_strided_slice %3 {offsets = [40, 128], sizes = [4, 128], strides = [1, 1]} : vector<48x768xbf16> to vector<4x128xbf16>
    %159 = vector.extract_strided_slice %3 {offsets = [40, 256], sizes = [4, 128], strides = [1, 1]} : vector<48x768xbf16> to vector<4x128xbf16>
    %160 = vector.extract_strided_slice %3 {offsets = [40, 384], sizes = [4, 128], strides = [1, 1]} : vector<48x768xbf16> to vector<4x128xbf16>
    %161 = vector.extract_strided_slice %3 {offsets = [40, 512], sizes = [4, 128], strides = [1, 1]} : vector<48x768xbf16> to vector<4x128xbf16>
    %162 = vector.extract_strided_slice %3 {offsets = [40, 640], sizes = [4, 128], strides = [1, 1]} : vector<48x768xbf16> to vector<4x128xbf16>
    %163 = tpu.concatenate %156, %157, %158, %159, %160, %161, %162 in 0 : vector<4x128xbf16>, vector<4x128xbf16>, vector<4x128xbf16>, vector<4x128xbf16>, vector<4x128xbf16>, vector<4x128xbf16>, vector<4x128xbf16> -> vector<28x128xbf16>
    %cst_38 = arith.constant dense<0.000000e+00> : vector<8x128xf32>
    %164 = tpu.matmul %4, %163, %cst_38 {dimension_numbers = #tpu.dot_dimension_numbers<[1], [0], [0], [1], [0, 0, 1, 1], [], []>} : vector<8x28xbf16>, vector<28x128xbf16>, vector<8x128xf32> -> vector<8x128xf32>
    %165 = vector.broadcast %5 : vector<8x1xf32> to vector<8x128xf32>
    %166 = arith.addf %164, %165 : vector<8x128xf32>
    %167 = arith.truncf %166 : vector<8x128xf32> to vector<8x128xbf16>
    %c10 = arith.constant 10 : index
    %c0_39 = arith.constant 0 : index
    %c0_40 = arith.constant 0 : index
    %168 = vector.load %arg5[%c10, %c0_39, %c0_40] : memref<12x8x128xbf16, #tpu.memory_space<vmem>>, vector<1x8x128xbf16>
    %169 = vector.shape_cast %168 : vector<1x8x128xbf16> to vector<8x128xbf16>
    %170 = vector.shape_cast %167 : vector<8x128xbf16> to vector<1x8x128xbf16>
    tpu.vector_store %arg5[%c10, %c0_39, %c0_40], %170 {strides = array<i32>} : memref<12x8x128xbf16, #tpu.memory_space<vmem>>, vector<1x8x128xbf16>,
    %171 = vector.extract_strided_slice %0 {offsets = [44, 0], sizes = [4, 128], strides = [1, 1]} : vector<48x128xbf16> to vector<4x128xbf16>
    %172 = vector.extract_strided_slice %3 {offsets = [44, 0], sizes = [4, 128], strides = [1, 1]} : vector<48x768xbf16> to vector<4x128xbf16>
    %173 = vector.extract_strided_slice %3 {offsets = [44, 128], sizes = [4, 128], strides = [1, 1]} : vector<48x768xbf16> to vector<4x128xbf16>
    %174 = vector.extract_strided_slice %3 {offsets = [44, 256], sizes = [4, 128], strides = [1, 1]} : vector<48x768xbf16> to vector<4x128xbf16>
    %175 = vector.extract_strided_slice %3 {offsets = [44, 384], sizes = [4, 128], strides = [1, 1]} : vector<48x768xbf16> to vector<4x128xbf16>
    %176 = vector.extract_strided_slice %3 {offsets = [44, 512], sizes = [4, 128], strides = [1, 1]} : vector<48x768xbf16> to vector<4x128xbf16>
    %177 = vector.extract_strided_slice %3 {offsets = [44, 640], sizes = [4, 128], strides = [1, 1]} : vector<48x768xbf16> to vector<4x128xbf16>
    %178 = tpu.concatenate %171, %172, %173, %174, %175, %176, %177 in 0 : vector<4x128xbf16>, vector<4x128xbf16>, vector<4x128xbf16>, vector<4x128xbf16>, vector<4x128xbf16>, vector<4x128xbf16>, vector<4x128xbf16> -> vector<28x128xbf16>
    %cst_41 = arith.constant dense<0.000000e+00> : vector<8x128xf32>
    %179 = tpu.matmul %4, %178, %cst_41 {dimension_numbers = #tpu.dot_dimension_numbers<[1], [0], [0], [1], [0, 0, 1, 1], [], []>} : vector<8x28xbf16>, vector<28x128xbf16>, vector<8x128xf32> -> vector<8x128xf32>
    %180 = vector.broadcast %5 : vector<8x1xf32> to vector<8x128xf32>
    %181 = arith.addf %179, %180 : vector<8x128xf32>
    %182 = arith.truncf %181 : vector<8x128xf32> to vector<8x128xbf16>
    %c11 = arith.constant 11 : index
    %c0_42 = arith.constant 0 : index
    %c0_43 = arith.constant 0 : index
    %183 = vector.load %arg5[%c11, %c0_42, %c0_43] : memref<12x8x128xbf16, #tpu.memory_space<vmem>>, vector<1x8x128xbf16>
    %184 = vector.shape_cast %183 : vector<1x8x128xbf16> to vector<8x128xbf16>
    %185 = vector.shape_cast %182 : vector<8x128xbf16> to vector<1x8x128xbf16>
    tpu.vector_store %arg5[%c11, %c0_42, %c0_43], %185 {strides = array<i32>} : memref<12x8x128xbf16, #tpu.memory_space<vmem>>, vector<1x8x128xbf16>,
    return
  }
  func.func @transform_0(%arg0: i32) -> (i32, i32) {
    %c0_i32 = arith.constant 0 : i32
    %c0_i32_0 = arith.constant 0 : i32
    return %arg0, %c0_i32 : i32, i32
  }
  func.func @transform_1(%arg0: i32) -> (i32, i32) {
    %c0_i32 = arith.constant 0 : i32
    %c0_i32_0 = arith.constant 0 : i32
    %c0_i32_1 = arith.constant 0 : i32
    return %c0_i32, %c0_i32_0 : i32, i32
  }
  func.func @transform_2(%arg0: i32) -> (i32, i32) {
    %c0_i32 = arith.constant 0 : i32
    %c0_i32_0 = arith.constant 0 : i32
    %c0_i32_1 = arith.constant 0 : i32
    return %c0_i32, %c0_i32_0 : i32, i32
  }
  func.func @transform_3(%arg0: i32) -> (i32, i32) {
    %c0_i32 = arith.constant 0 : i32
    %c0_i32_0 = arith.constant 0 : i32
    %c0_i32_1 = arith.constant 0 : i32
    return %c0_i32, %c0_i32_0 : i32, i32
  }
  func.func @transform_4(%arg0: i32) -> (i32, i32, i32) {
    %c0_i32 = arith.constant 0 : i32
    %c0_i32_0 = arith.constant 0 : i32
    %c0_i32_1 = arith.constant 0 : i32
    return %arg0, %c0_i32, %c0_i32_0 : i32, i32, i32
  }
}

</mosaic_0001>

<bundles_post_ra>
// kernel: gcn_forward.1
= control target key start
LH: loop header
LB: loop body
LE: loop exit
PB: predicated region body
PF: predicated region fallthrough
CT: control target
= control target key end

     0   :  { %s1920_s15 = smov 0   ;;  %s2445_s0 = inlined_call_operand.vmem [shape: bf16[96,128], index: 0, kind: input, shape index: {}]   ;;  %s2446_s1 = inlined_call_operand.vmem [shape: bf16[128,768], index: 1, kind: input, shape index: {}]   ;;  %s2447_s2 = inlined_call_operand.vmem [shape: bf16[8,28], index: 2, kind: input, shape index: {}]   ;;  %s2448_s3 = inlined_call_operand.vmem [shape: f32[8,1], index: 3, kind: input, shape index: {}]   ;;  %s2449_s4 = inlined_call_operand.vmem [shape: bf16[24,8,128], index: 4, kind: output, shape index: {}]  }
   0x1 LB: > { %s1570_s16 = sadd.s32 4294967295, %s1890_s15   ;;  %p1574_p0 = scmp.ge.s32.totalorder %s1890_s15, 1  ;;  %s1890_s15 = sphi %s1920_s15, %s14_s15  }
   0x2   : > { %p163_p1 = scmp.lt.s32.totalorder %s1890_s15, 3 }
   0x4   : > { %p164_p2 = pnand %p1574_p0, %p163_p1 }
   0x5   : > { %s189_s17 = smul.u32 (!%p164_p2), 6, %s1570_s16 }
   0x6   : > { %167 = sbr.rel (%p164_p2) target bundleno = 544 (0x220), region = 36 }
   0x7   : > { %p190_p3 = scmp.lt.s32.totalorder (!%p164_p2), %s189_s17, 11  ;;  %s195_s27 = smul.u32 (!%p164_p2), 12, %s1570_s16 }
   0x9   : > { %p196_p4 = scmp.lt.s32.totalorder (!%p164_p2), %s195_s27, 23 }
   0xb   : > { %v1803_v0 = vld [vmem:[%s2446_s1 + $0x154] ss:$24 sps:$4 sm:$0xff]   ;;  %v1805_v1 = vld [vmem:[%s2446_s1 + $0x150] ss:$24 sps:$4 sm:$0xff]   ;;  %v1892_v2 = vmov 0   ;;  %s2451_s17 = smov (!%p190_p3, %s189_s17), 11 }
   0xc   : > { %546 = vmatprep.mubr.bf16.mxu0 %v1892_v2  ;;  %609 = vmatprep.mubr.bf16.mxu1 %v1892_v2  ;;  %v1806_v3 = vld [vmem:[%s2446_s1 + $0x15c] ss:$24 sps:$4 sm:$0xff]   ;;  %v1808_v4 = vld [vmem:[%s2446_s1 + $0x158] ss:$24 sps:$4 sm:$0xff]   ;;  %v1812_v7 = vld [vmem:[%s2446_s1 + $0x12c] ss:$24 sps:$4 sm:$0xff]  }
   0xd   : > { %514 = vmatprep.subr.bf16.mxu0 %v1803_v0  ;;  %1802 = vset.pattern.permute.xlu0 %v1892_v2  ;;  %v1809_v5 = vld [vmem:[%s2446_s1 + $0x124] ss:$24 sps:$4 sm:$0xff]   ;;  %v1811_v6 = vld [vmem:[%s2446_s1 + $0x120] ss:$24 sps:$4 sm:$0xff]   ;;  %v1815_v9 = vld [vmem:[%s2446_s1 + $0xf4] ss:$24 sps:$4 sm:$0xff]  }
   0xe   : > { %515 = vmatpush1.bf16.msra.mxu0 %v1805_v1  ;;  %577 = vmatprep.subr.bf16.mxu1 %v1806_v3  ;;  %v1814_v8 = vld [vmem:[%s2446_s1 + $0x128] ss:$24 sps:$4 sm:$0xff]   ;;  %v1818_v11 = vld [vmem:[%s2446_s1 + $0xfc] ss:$24 sps:$4 sm:$0xff]   ;;  %v1820_v13 = vld [vmem:[%s2446_s1 + $0xf8] ss:$24 sps:$4 sm:$0xff]  }
   0xf   : > { %578 = vmatpush1.bf16.msra.mxu1 %v1808_v4  ;;  %516 = vmatprep.subr.bf16.mxu0 %v1809_v5  ;;  %v1817_v10 = vld [vmem:[%s2446_s1 + $0xf0] ss:$24 sps:$4 sm:$0xff]   ;;  %v1821_v12 = vld [vmem:[%s2446_s1 + $0xc4] ss:$24 sps:$4 sm:$0xff]   ;;  %v1823_v15 = vld [vmem:[%s2446_s1 + $0xc0] ss:$24 sps:$4 sm:$0xff]  }
  0x10   : > { %579 = vmatprep.subr.bf16.mxu1 %v1812_v7  ;;  %v1824_v14 = vld [vmem:[%s2446_s1 + $0xcc] ss:$24 sps:$4 sm:$0xff]   ;;  %v1826_v17 = vld [vmem:[%s2446_s1 + $0xc8] ss:$24 sps:$4 sm:$0xff]   ;;  %v1830_v18 = vld [vmem:[%s2446_s1 + $0x9c] ss:$24 sps:$4 sm:$0xff]  }
  0x11   : > { %v1827_v16 = vld [vmem:[%s2446_s1 + $0x94] ss:$24 sps:$4 sm:$0xff]   ;;  %v1829_v19 = vld [vmem:[%s2446_s1 + $0x90] ss:$24 sps:$4 sm:$0xff]   ;;  %v1833_v20 = vld [vmem:[%s2446_s1 + $0x64] ss:$24 sps:$4 sm:$0xff]  }
  0x12   : > { %517 = vmatpush1.bf16.msra.mxu0 %v1811_v6  ;;  %v1832_v21 = vld [vmem:[%s2446_s1 + $0x98] ss:$24 sps:$4 sm:$0xff]   ;;  %v1836_v22 = vld [vmem:[%s2446_s1 + $0x6c] ss:$24 sps:$4 sm:$0xff]   ;;  %s1575_s19 = sshll.u32 %s2451_s17, 2  ;;  %v1893_v58 = vmov 0.0  }
  0x13   : > { %518 = vmatprep.subr.bf16.mxu0 %v1815_v9  ;;  %580 = vmatpush1.bf16.msra.mxu1 %v1814_v8  ;;  %v1835_v23 = vld [vmem:[%s2446_s1 + $0x60] ss:$24 sps:$4 sm:$0xff]   ;;  %v1839_v24 = vld [vmem:[%s2446_s1 + $0x34] ss:$24 sps:$4 sm:$0xff]   ;;  %v1841_v27 = vld [vmem:[%s2446_s1 + $0x30] ss:$24 sps:$4 sm:$0xff]   ;;  %s2017_s28 = scalar_lea.vmem %s2445_s0, %s1575_s19 }
  0x14   : > { %581 = vmatprep.subr.bf16.mxu1 %v1818_v11  ;;  %v1838_v25 = vld [vmem:[%s2446_s1 + $0x68] ss:$24 sps:$4 sm:$0xff]   ;;  %v1842_v26 = vld [vmem:[%s2446_s1 + $0x3c] ss:$24 sps:$4 sm:$0xff]   ;;  %v1844_v29 = vld [vmem:[%s2446_s1 + $0x38] ss:$24 sps:$4 sm:$0xff]  }
  0x15   : > { %v1845_v28 = vld [vmem:[%s2446_s1 + $0x4] ss:$24 sps:$4 sm:$0xff]   ;;  %v1847_v30 = vld [vmem:[%s2446_s1] ss:$24 sps:$4 sm:$0xff]   ;;  %v1859_v38 = vld [vmem:[%s2446_s1 + $0x134] ss:$24 sps:$4 sm:$0xff]  }
  0x16   : > { %519 = vmatpush1.bf16.msra.mxu0 %v1817_v10  ;;  %v1848_v31 = vld [vmem:[%s2446_s1 + $0xc] ss:$24 sps:$4 sm:$0xff]   ;;  %v2032_v32 = vld [vmem:[%s2017_s28] sm:$0xf]  ;;  %v1857_v39 = vld [vmem:[%s2446_s1 + $0x130] ss:$24 sps:$4 sm:$0xff]  }
  0x17   : > { %520 = vmatprep.subr.bf16.mxu0 %v1821_v12  ;;  %582 = vmatpush1.bf16.msra.mxu1 %v1820_v13  ;;  %v2035_v33 = vld [vmem:[%s2017_s28 + $0x4] sm:$0xf]  ;;  %v1850_v35 = vld [vmem:[%s2446_s1 + $0x8] ss:$24 sps:$4 sm:$0xff]   ;;  %v2059_v41 = vld [vmem:[%s2017_s28 + $0xc] sm:$0xf] }
  0x18   : > { %583 = vmatprep.subr.bf16.mxu1 %v1824_v14  ;;  %v1856_v34 = vld [vmem:[%s2446_s1 + $0x164] ss:$24 sps:$4 sm:$0xff]   ;;  %v1577_v36 = vcombine.low %v2032_v32, %v2035_v33  ;;  %v1854_v37 = vld [vmem:[%s2446_s1 + $0x160] ss:$24 sps:$4 sm:$0xff]   ;;  %v2056_v40 = vld [vmem:[%s2017_s28 + $0x8] sm:$0xf] }
  0x19   : > { %v1862_v42 = vld [vmem:[%s2446_s1 + $0x104] ss:$24 sps:$4 sm:$0xff]   ;;  %v1578_v43 = vcombine.low %v2056_v40, %v2059_v41  ;;  %v1860_v44 = vld [vmem:[%s2446_s1 + $0x100] ss:$24 sps:$4 sm:$0xff]   ;;  %v1868_v45 = vld [vmem:[%s2446_s1 + $0xd4] ss:$24 sps:$4 sm:$0xff]  }
  0x1a   : > { %521 = vmatpush1.bf16.msra.mxu0 %v1823_v15  ;;  %v1866_v46 = vld [vmem:[%s2446_s1 + $0xd0] ss:$24 sps:$4 sm:$0xff]   ;;  %v2081_v48 = vld [vmem:[%s2017_s28 + $0x14] sm:$0xf]  ;;  %v1871_v49 = vld [vmem:[%s2446_s1 + $0xa4] ss:$24 sps:$4 sm:$0xff]  }
  0x1b   : > { %522 = vmatprep.subr.bf16.mxu0 %v1827_v16  ;;  %584 = vmatpush1.bf16.msra.mxu1 %v1826_v17  ;;  %v2078_v47 = vld [vmem:[%s2017_s28 + $0x10] sm:$0xf]  ;;  %v1869_v51 = vld [vmem:[%s2446_s1 + $0xa0] ss:$24 sps:$4 sm:$0xff]   ;;  %v1877_v52 = vld [vmem:[%s2446_s1 + $0x74] ss:$24 sps:$4 sm:$0xff]  }
  0x1c   : > { %585 = vmatprep.subr.bf16.mxu1 %v1830_v18  ;;  %v1579_v50 = vcombine.low %v2078_v47, %v2081_v48  ;;  %v1875_v53 = vld [vmem:[%s2446_s1 + $0x70] ss:$24 sps:$4 sm:$0xff]   ;;  %v1880_v54 = vld [vmem:[%s2446_s1 + $0x44] ss:$24 sps:$4 sm:$0xff]   ;;  %v1878_v55 = vld [vmem:[%s2446_s1 + $0x40] ss:$24 sps:$4 sm:$0xff]  }
  0x1d   : > { %v1883_v56 = vld [vmem:[%s2446_s1 + $0x14] ss:$24 sps:$4 sm:$0xff]   ;;  %v1881_v57 = vld [vmem:[%s2446_s1 + $0x10] ss:$24 sps:$4 sm:$0xff]   ;;  %vm1894_vm0 = vmmov 0   ;;  %v722_v59 = vld [vmem:[%s2448_s3] sm:$0xff] }
  0x1e   : > { %523 = vmatpush1.bf16.msra.mxu0 %v1829_v19  ;;  %751 = vperm.xlu0 %1802, %v722_v59   ;;  %vm733_vm1 = vcmask 1041408   ;;  %vm737_vm2 = vcmask 1043456   ;;  %vm740_vm3 = vcmask 1045504   ;;  %vm754_vm4 = vcmask 228352   ;;  %s2453_s27 = smov (!%p196_p4, %s195_s27), 23 }
  0x1f   : > { %524 = vmatprep.subr.bf16.mxu0 %v1833_v20  ;;  %586 = vmatpush1.bf16.msra.mxu1 %v1832_v21  ;;  %s1576_s17 = sshll.u32 %s2453_s27, 2 }
  0x20   : > { %587 = vmatprep.subr.bf16.mxu1 %v1836_v22  ;;  %s2417_s5 = scalar_lea.vmem %s2449_s4, %s1576_s17 }
  0x22   : > { %525 = vmatpush1.bf16.msra.mxu0 %v1835_v23 }
  0x23   : > { %526 = vmatprep.subr.bf16.mxu0 %v1839_v24  ;;  %588 = vmatpush1.bf16.msra.mxu1 %v1838_v25 }
  0x24   : > { %589 = vmatprep.subr.bf16.mxu1 %v1842_v26 }
  0x26   : > { %527 = vmatpush1.bf16.msra.mxu0 %v1841_v27 }
  0x27   : > { %528 = vmatprep.subr.bf16.mxu0 %v1845_v28  ;;  %590 = vmatpush1.bf16.msra.mxu1 %v1844_v29 }
  0x28   : > { %591 = vmatprep.subr.bf16.mxu1 %v1848_v31 }
  0x2a   : > { %529 = vmatpush1.bf16.msra.mxu0 %v1847_v30 }
  0x2b   : > { %640 = vmatprep.subr.bf16.mxu0 %v1856_v34  ;;  %592 = vmatpush1.bf16.msra.mxu1 %v1850_v35  ;;  %v1629_v35 = vcombine.low %v2032_v32, %v2032_v32 }
  0x2c   : > { %1695 = vmatprep.subr.bf16.mxu1 %v1893_v58 }
  0x2d   : > { %547 = vmatmul.mubr.bf16.vlgmr.msra.gmra.mxu0 %v1577_v36 }
  0x2e   : > { %641 = vmatpush1.bf16.msra.mxu0 %v1854_v37  ;;  %556 = vmatprep.mubr.bf16.mxu0 %v1892_v2 }
  0x2f   : > { %610 = vmatmul.mubr.bf16.vlgmr.msra.gmra.mxu1 %v1577_v36  ;;  %642 = vmatprep.subr.bf16.mxu0 %v1859_v38 }
  0x30   : > { %619 = vmatprep.mubr.bf16.mxu1 %v1892_v2 }
  0x32   : > { %643 = vmatpush1.bf16.msra.mxu0 %v1857_v39 }
  0x33   : > { %644 = vmatprep.subr.bf16.mxu0 %v1862_v42 }
  0x35   : > { %557 = vmatmul.mubr.bf16.gmra.mxu0 %v1578_v43 }
  0x36   : > { %645 = vmatpush1.bf16.msra.mxu0 %v1860_v44  ;;  %566 = vmatprep.mubr.bf16.mxu0 %v1892_v2 }
  0x37   : > { %620 = vmatmul.mubr.bf16.gmra.mxu1 %v1578_v43  ;;  %646 = vmatprep.subr.bf16.mxu0 %v1868_v45 }
  0x38   : > { %629 = vmatprep.mubr.bf16.mxu1 %v1892_v2 }
  0x3a   : > { %647 = vmatpush1.bf16.msra.mxu0 %v1866_v46 }
  0x3b   : > { %648 = vmatprep.subr.bf16.mxu0 %v1871_v49 }
  0x3d   : > { %567 = vmatmul.mubr.bf16.gmra.mxu0 %v1579_v50 }
  0x3e   : > { %649 = vmatpush1.bf16.msra.mxu0 %v1869_v51  ;;  %672 = vmatprep.mubr.bf16.mxu0 %v1892_v2 }
  0x3f   : > { %630 = vmatmul.mubr.bf16.gmra.mxu1 %v1579_v50  ;;  %650 = vmatprep.subr.bf16.mxu0 %v1877_v52  ;;  %v803_v52 = vrot.slane %v1629_v35, 2 }
  0x40   : > { %1699 = vmatprep.mubr.msk.bf16.mxu1 %vm1894_vm0, %v1893_v58 }
  0x42   : > { %651 = vmatpush1.bf16.msra.mxu0 %v1875_v53 }
  0x43   : > { %652 = vmatprep.subr.bf16.mxu0 %v1880_v54 }
  0x46   : > { %653 = vmatpush1.bf16.msra.mxu0 %v1878_v55 }
  0x47   : > { %654 = vmatprep.subr.bf16.mxu0 %v1883_v56 }
  0x4a   : > { %655 = vmatpush1.bf16.msra.mxu0 %v1881_v57 }
  0x4b   : > { %1727 = vmatprep.subr.bf16.mxu0 %v1893_v58 }
  0x4d   : > { %673 = vmatmul.mubr.bf16.vlgmr.msra.gmra.mxu0 %v1577_v36 }
  0x4e   : > { %682 = vmatprep.mubr.bf16.mxu0 %v1892_v2 }
  0x55   : > { %683 = vmatmul.mubr.bf16.gmra.mxu0 %v1578_v43 }
  0x56   : > { %692 = vmatprep.mubr.bf16.mxu0 %v1892_v2 }
  0x5d   : > { %693 = vmatmul.mubr.bf16.gmra.mxu0 %v1579_v50 }
  0x5e   : > { %1731 = vmatprep.mubr.msk.bf16.mxu0 %vm1894_vm0, %v1893_v58 }
  0xed   : > { %v548_v60 = vpop.f32.mrf.mxu0 }
  0xef   : > { %v550_v61 = vpop.f32.mrf.mxu0  ;;  %v611_v2 = vpop.f32.mrf.mxu1 }
  0xf1   : > { %v552_v62 = vpop.f32.mrf.mxu0  ;;  %v613_v5 = vpop.f32.mrf.mxu1 }
  0xf2   : > { %v2130_v15 = vpack.c.bf16 %v552_v62, %v548_v60 }
  0xf3   : > { %v554_v63 = vpop.f32.mrf.mxu0  ;;  %v615_v7 = vpop.f32.mrf.mxu1 }
  0xf4   : > { %v2132_v18 = vpack.c.bf16 %v554_v63, %v550_v61  ;;  %v724_v20 = vrot.slane %v2130_v15, 6  ;;  %v2137_v23 = vpack.c.bf16 %v615_v7, %v611_v2  ;;  %v1634_v7 = vcombine.low %v2035_v33, %v2035_v33 }
  0xf5   : > { %v558_v0 = vpop.f32.mrf.mxu0  ;;  %v617_v9 = vpop.f32.mrf.mxu1 }
  0xf6   : > { %v2139_v24 = vpack.c.bf16 %v617_v9, %v613_v5  ;;  %v726_v28 = vrot.slane %v2132_v18, 4  ;;  %v736_v34 = vsel %vm733_vm1, %v2032_v32, %v724_v20  ;;  %v728_v39 = vrot.slane %v2137_v23, 2 }
  0xf7   : > { %v560_v1 = vpop.f32.mrf.mxu0  ;;  %v621_v11 = vpop.f32.mrf.mxu1  ;;  %v804_v55 = vrot.slane %v2132_v18, 6 }
  0xf8   : > { %v807_v42 = vrot.slane %v2139_v24, 2  ;;  %v739_v46 = vsel %vm737_vm2, %v736_v34, %v726_v28 }
  0xf9   : > { %v562_v3 = vpop.f32.mrf.mxu0  ;;  %v623_v13 = vpop.f32.mrf.mxu1  ;;  %v742_v62 = vsel %vm740_vm3, %v739_v46, %v728_v39 }
  0xfa   : > { %v2157_v43 = vpack.c.bf16 %v562_v3, %v558_v0  ;;  %v2184_v3 = vld [vmem:[%s2447_s2] sm:$0xf] }
  0xfb   : > { %v564_v4 = vpop.f32.mrf.mxu0  ;;  %v625_v17 = vpop.f32.mrf.mxu1 }
  0xfc   : > { %v2161_v49 = vpack.c.bf16 %v564_v4, %v560_v1  ;;  %v995_v53 = vrot.slane %v2157_v43, 6  ;;  %v2191_v9 = vpack.c.bf16 %v625_v17, %v621_v11  ;;  %v811_v11 = vsel %vm733_vm1, %v803_v52, %v2130_v15 }
  0xfd   : > { %v2122_v6 = vpop.f32.mrf.mxu0  ;;  %v627_v25 = vpop.f32.mrf.mxu1  ;;  %v1127_v39 = vrot.slane %v2157_v43, 2 }
  0xfe   : > { %v2163_v32 = vpack.c.bf16 %v627_v25, %v623_v13  ;;  %v997_v1 = vrot.slane %v2161_v49, 4  ;;  %v805_v25 = vrot.slane %v2137_v23, 4  ;;  %v999_v28 = vrot.slane %v2191_v9, 2 }
  0xff   : > { %v2124_v8 = vpop.f32.mrf.mxu0  ;;  %v2152_v37 = vpop.f32.mrf.mxu1 }
 0x100   : > { %v1129_v60 = vrot.slane %v2163_v32, 4 }
 0x101   : > { %v2126_v10 = vpop.f32.mrf.mxu0  ;;  %v633_v56 = vpop.f32.mrf.mxu1 }
 0x103   : > { %v2128_v12 = vpop.f32.mrf.mxu0  ;;  %v2198_v20 = vpop.f32.mrf.mxu1 }
 0x10d   : > { %v674_v14 = vpop.f32.mrf.mxu0 }
 0x10f   : > { %v676_v16 = vpop.f32.mrf.mxu0 }
 0x111   : > { %v678_v19 = vpop.f32.mrf.mxu0 }
 0x112   : > { %v2135_v21 = vpack.c.bf16 %v678_v19, %v674_v14  ;;  %v1006_v14 = vsel %vm733_vm1, %v2056_v40, %v995_v53  ;;  %v869_v19 = vrot.slane %v2139_v24, 4 }
 0x113   : > { %v680_v22 = vpop.f32.mrf.mxu0  ;;  %v1008_v34 = vsel %vm737_vm2, %v1006_v14, %v997_v1 }
 0x114   : > { %v730_v26 = vrot.slane %v2135_v21, 6  ;;  %v2142_v27 = vpack.c.bf16 %v680_v22, %v676_v16  ;;  %v819_v63 = vsel %vm733_vm1, %v807_v42, %v2135_v21  ;;  %v870_v13 = vrot.slane %v2135_v21, 2 }
 0x115   : > { %v684_v29 = vpop.f32.mrf.mxu0  ;;  %v1010_v52 = vsel %vm740_vm3, %v1008_v34, %v999_v28 }
 0x116   : > { %v732_v30 = vrot.slane %v2142_v27, 4  ;;  %v746_v31 = vsel %vm733_vm1, %v2139_v24, %v730_v26  ;;  %v808_v50 = vrot.slane %v2142_v27, 6  ;;  %v881_v42 = vsel %vm733_vm1, %v869_v19, %v870_v13 }
 0x117   : > { %v686_v36 = vpop.f32.mrf.mxu0 }
 0x118   : > { %v748_v38 = vsel %vm737_vm2, %v746_v31, %v732_v30  ;;  %v821_v4 = vsel %vm737_vm2, %v819_v63, %v808_v50  ;;  %v813_v31 = vsel %vm737_vm2, %v811_v11, %v804_v55  ;;  %v930_v55 = vrot.slane %v1634_v7, 2 }
 0x119   : > { %v688_v44 = vpop.f32.mrf.mxu0  ;;  %v758_v45 = vsel %vm740_vm3, %v748_v38, 0  ;;  %v822_v17 = vsel %vm740_vm3, %v821_v4, 0  ;;  %v867_v38 = vrot.slane %v2130_v15, 2  ;;  %v815_v50 = vsel %vm740_vm3, %v813_v31, %v805_v25 }
 0x11a   : > { %v2166_v51 = vpack.c.bf16 %v688_v44, %v684_v29  ;;  %1696 = vmatpush3.bf16.msra.mxu1 %v758_v45  ;;  %v931_v63 = vrot.slane %v2130_v15, 4  ;;  %v1128_v15 = vrot.slane %v2191_v9, 6  ;;  %v2258_v4 = vpack.c.bf16 %v2128_v12, %v2124_v8 }
 0x11b   : > { %v690_v54 = vpop.f32.mrf.mxu0  ;;  %1697 = vmatprep.subr.bf16.mxu1 %v1893_v58  ;;  %v1639_v8 = vcombine.low %v2056_v40, %v2056_v40 }
 0x11c   : > { %v1001_v57 = vrot.slane %v2166_v51, 6  ;;  %v2172_v59 = vpack.c.bf16 %v690_v54, %v686_v36  ;;  %v1130_v61 = vrot.slane %v2166_v51, 2  ;;  %v637_v36 = vpop.f32.mrf.mxu1  ;;  %v1257_v40 = vrot.slane %v2258_v4, 4 }
 0x11d   : > { %v694_v0 = vpop.f32.mrf.mxu0  ;;  %v2228_v54 = vpack.c.bf16 %v637_v36, %v633_v56  ;;  %v1133_v56 = vsel %vm733_vm1, %v2059_v41, %v1127_v39  ;;  %v938_v11 = vsel %vm733_vm1, %v930_v55, %v931_v63 }
 0x11e   : > { %v1003_v2 = vrot.slane %v2172_v59, 4  ;;  %1698 = vmatpush3.bf16.msra.mxu1 %v742_v62  ;;  %v1014_v5 = vsel %vm733_vm1, %v2163_v32, %v1001_v57  ;;  %v1141_v30 = vsel %vm733_vm1, %v1129_v60, %v1130_v61  ;;  %v883_v57 = vsel %vm737_vm2, %v881_v42, %v2142_v27 }
 0x11f   : > { %1703 = vmatprep.subr.bf16.mxu1 %v1893_v58  ;;  %v696_v16 = vpop.f32.mrf.mxu0  ;;  %v1143_v45 = vsel %vm737_vm2, %v1141_v30, %v2172_v59  ;;  %v934_v60 = vrot.slane %v2135_v21, 4  ;;  %v873_v62 = vsel %vm733_vm1, %v2035_v33, %v867_v38  ;;  %v868_v21 = vrot.slane %v2137_v23, 6 }
 0x120   : > { %v1016_v22 = vsel %vm737_vm2, %v1014_v5, %v1003_v2  ;;  %v1144_v61 = vsel %vm740_vm3, %v1143_v45, 0  ;;  %v2246_v2 = vpack.c.bf16 %v2126_v10, %v2122_v6  ;;  %v884_v33 = vsel %vm740_vm3, %v883_v57, 0 }
 0x121   : > { %1700 = vmatmul.mubr.msk.bf16.vlgmr.msra.gmra.mxu1 %vm754_vm4, %v2184_v3  ;;  %v1017_v26 = vsel %vm740_vm3, %v1016_v22, 0  ;;  %v698_v29 = vpop.f32.mrf.mxu0  ;;  %v935_v6 = vrot.slane %v2142_v27, 2  ;;  %v875_v10 = vsel %vm737_vm2, %v873_v62, %v2132_v18  ;;  %v1135_v5 = vsel %vm737_vm2, %v1133_v56, %v2161_v49 }
 0x122   : > { %1704 = vmatpush3.bf16.msra.mxu1 %v822_v17  ;;  %1728 = vmatpush3.bf16.msra.mxu0 %v1017_v26  ;;  %v2212_v35 = vpack.c.bf16 %v698_v29, %v694_v0  ;;  %v933_v0 = vrot.slane %v2139_v24, 6  ;;  %v1255_v7 = vrot.slane %v2246_v2, 6  ;;  %v1389_v14 = vrot.slane %v2228_v54, 4 }
 0x123   : > { %1705 = vmatprep.subr.bf16.mxu1 %v1893_v58  ;;  %1729 = vmatprep.subr.bf16.mxu0 %v1893_v58  ;;  %v700_v44 = vpop.f32.mrf.mxu0  ;;  %v1137_v19 = vsel %vm740_vm3, %v1135_v5, %v1128_v15  ;;  %v932_v22 = vrot.slane %v2132_v18, 2  ;;  %v1067_v17 = vrot.slane %v2163_v32, 2  ;;  %v2287_v26 = vpack.c.bf16 %v2198_v20, %v2152_v37 }
 0x124   : > { %1707 = vmatprep.mubr.msk.bf16.mxu1 %vm1894_vm0, %v1893_v58  ;;  %v2223_v46 = vpack.c.bf16 %v700_v44, %v696_v16  ;;  %v1261_v53 = vrot.slane %v2212_v35, 6  ;;  %v946_v13 = vsel %vm733_vm1, %v933_v0, %v934_v60  ;;  %v1390_v27 = vrot.slane %v2212_v35, 2 }
 0x125   : > { %v877_v16 = vsel %vm740_vm3, %v875_v10, %v868_v21  ;;  %v948_v25 = vsel %vm737_vm2, %v946_v13, %v935_v6  ;;  %v1266_v28 = vsel %vm733_vm1, %v2078_v47, %v1255_v7  ;;  %v1259_v37 = vrot.slane %v2287_v26, 2 }
 0x126   : > { %1706 = vmatpush3.bf16.msra.mxu1 %v815_v50  ;;  %1730 = vmatpush3.bf16.msra.mxu0 %v1010_v52  ;;  %v1263_v1 = vrot.slane %v2223_v46, 4  ;;  %v1274_v24 = vsel %vm733_vm1, %v2228_v54, %v1261_v53  ;;  %v949_v29 = vsel %vm740_vm3, %v948_v25, 0  ;;  %v1401_v20 = vsel %vm733_vm1, %v1389_v14, %v1390_v27 }
 0x127   : > { %1711 = vmatprep.subr.bf16.mxu1 %v1893_v58  ;;  %1743 = vmatprep.subr.bf16.mxu0 %v1893_v58  ;;  %v1063_v30 = vrot.slane %v1639_v8, 2  ;;  %v1068_v31 = vrot.slane %v2172_v59, 6  ;;  %v940_v34 = vsel %vm737_vm2, %v938_v11, %v932_v22  ;;  %v1268_v36 = vsel %vm737_vm2, %v1266_v28, %v1257_v40 }
 0x128   : > { %v1276_v12 = vsel %vm737_vm2, %v1274_v24, %v1263_v1  ;;  %v1387_v38 = vrot.slane %v2246_v2, 2  ;;  %v1079_v39 = vsel %vm733_vm1, %v1067_v17, %v2166_v51  ;;  %v1403_v42 = vsel %vm737_vm2, %v1401_v20, %v2223_v46 }
 0x129   : > { %1708 = vmatmul.mubr.msk.bf16.vlgmr.msra.gmra.mxu1 %vm754_vm4, %v2184_v3  ;;  %1732 = vmatmul.mubr.msk.bf16.vlgmr.msra.gmra.mxu0 %vm754_vm4, %v2184_v3  ;;  %v1277_v18 = vsel %vm740_vm3, %v1276_v12, 0  ;;  %v942_v44 = vsel %vm740_vm3, %v940_v34, %v2137_v23  ;;  %v1270_v45 = vsel %vm740_vm3, %v1268_v36, %v1259_v37  ;;  %v1644_v50 = vcombine.low %v2059_v41, %v2059_v41  ;;  %v2411_v37 = vpop.permute.xlu0 %751 }
 0x12a   : > { %1712 = vmatpush3.bf16.msra.mxu1 %v884_v33  ;;  %1744 = vmatpush3.bf16.msra.mxu0 %v1144_v61  ;;  %v1064_v52 = vrot.slane %v2161_v49, 6  ;;  %v1081_v53 = vsel %vm737_vm2, %v1079_v39, %v1068_v31  ;;  %v1071_v55 = vsel %vm733_vm1, %v1063_v30, %v2157_v43  ;;  %v1193_v57 = vrot.slane %v2163_v32, 6 }
 0x12b   : > { %1713 = vmatprep.subr.bf16.mxu1 %v1893_v58  ;;  %1745 = vmatprep.subr.bf16.mxu0 %v1893_v58  ;;  %v1194_v60 = vrot.slane %v2166_v51, 4  ;;  %v1404_v23 = vsel %vm740_vm3, %v1403_v42, 0  ;;  %v1393_v41 = vsel %vm733_vm1, %v2081_v48, %v1387_v38  ;;  %v1082_v61 = vsel %vm740_vm3, %v1081_v53, 0 }
 0x12c   : > { %1715 = vmatprep.mubr.msk.bf16.mxu1 %vm1894_vm0, %v1893_v58  ;;  %1747 = vmatprep.mubr.msk.bf16.mxu0 %vm1894_vm0, %v1893_v58  ;;  %v1065_v32 = vrot.slane %v2191_v9, 4  ;;  %v1388_v51 = vrot.slane %v2287_v26, 6  ;;  %v1195_v62 = vrot.slane %v2172_v59, 2  ;;  %v1073_v56 = vsel %vm737_vm2, %v1071_v55, %v1064_v52 }
 0x12d   : > { %v1395_v63 = vsel %vm737_vm2, %v1393_v41, %v2258_v4  ;;  %v1190_v0 = vrot.slane %v1644_v50, 2  ;;  %v1191_v1 = vrot.slane %v2157_v43, 4  ;;  %v1206_v21 = vsel %vm733_vm1, %v1193_v57, %v1194_v60 }
 0x12e   : > { %1714 = vmatpush3.bf16.msra.mxu1 %v877_v16  ;;  %1746 = vmatpush3.bf16.msra.mxu0 %v1137_v19  ;;  %v1075_v59 = vsel %vm740_vm3, %v1073_v56, %v1065_v32  ;;  %v1397_v33 = vsel %vm740_vm3, %v1395_v63, %v1388_v51  ;;  %v1192_v15 = vrot.slane %v2161_v49, 2  ;;  %v1208_v43 = vsel %vm737_vm2, %v1206_v21, %v1195_v62 }
 0x12f   : > { %1719 = vmatprep.subr.bf16.mxu1 %v1893_v58  ;;  %1759 = vmatprep.subr.bf16.mxu0 %v1893_v58  ;;  %v1649_v24 = vcombine.low %v2078_v47, %v2078_v47  ;;  %v1327_v6 = vrot.slane %v2228_v54, 2  ;;  %v1198_v10 = vsel %vm733_vm1, %v1190_v0, %v1191_v1  ;;  %v1209_v5 = vsel %vm740_vm3, %v1208_v43, 0 }
 0x130   : > { %v1328_v49 = vrot.slane %v2223_v46, 6  ;;  %v1200_v7 = vsel %vm737_vm2, %v1198_v10, %v1192_v15  ;;  %v1324_v12 = vrot.slane %v2258_v4, 6  ;;  %v1654_v14 = vcombine.low %v2081_v48, %v2081_v48 }
 0x131   : > { %1716 = vmatmul.mubr.msk.bf16.vlgmr.msra.gmra.mxu1 %vm754_vm4, %v2184_v3  ;;  %1748 = vmatmul.mubr.msk.bf16.vlgmr.msra.gmra.mxu0 %vm754_vm4, %v2184_v3  ;;  %v1323_v47 = vrot.slane %v1649_v24, 2  ;;  %v1339_v13 = vsel %vm733_vm1, %v1327_v6, %v2212_v35  ;;  %v1202_v8 = vsel %vm740_vm3, %v1200_v7, %v2191_v9  ;;  %v1454_v16 = vrot.slane %v2212_v35, 4 }
 0x132   : > { %1720 = vmatpush3.bf16.msra.mxu1 %v949_v29  ;;  %1760 = vmatpush3.bf16.msra.mxu0 %v1277_v18  ;;  %v1341_v27 = vsel %vm737_vm2, %v1339_v13, %v1328_v49  ;;  %v1453_v19 = vrot.slane %v2228_v54, 6  ;;  %v1325_v40 = vrot.slane %v2287_v26, 4  ;;  %v1455_v25 = vrot.slane %v2223_v46, 2 }
 0x133   : > { %1721 = vmatprep.subr.bf16.mxu1 %v1893_v58  ;;  %1761 = vmatprep.subr.bf16.mxu0 %v1893_v58  ;;  %v1331_v22 = vsel %vm733_vm1, %v1323_v47, %v2246_v2  ;;  %v1342_v9 = vsel %vm740_vm3, %v1341_v27, 0  ;;  %v1450_v35 = vrot.slane %v1654_v14, 2  ;;  %v1451_v54 = vrot.slane %v2246_v2, 4 }
 0x134   : > { %1723 = vmatprep.mubr.msk.bf16.mxu1 %vm1894_vm0, %v1893_v58  ;;  %1763 = vmatprep.mubr.msk.bf16.mxu0 %vm1894_vm0, %v1893_v58  ;;  %v1333_v48 = vsel %vm737_vm2, %v1331_v22, %v1324_v12  ;;  %v1466_v11 = vsel %vm733_vm1, %v1453_v19, %v1454_v16  ;;  %v1452_v18 = vrot.slane %v2258_v4, 2 }
 0x135   : > { %v1335_v17 = vsel %vm740_vm3, %v1333_v48, %v1325_v40  ;;  %v1468_v46 = vsel %vm737_vm2, %v1466_v11, %v1455_v25  ;;  %v1458_v28 = vsel %vm733_vm1, %v1450_v35, %v1451_v54 }
 0x136   : > { %1722 = vmatpush3.bf16.msra.mxu1 %v942_v44  ;;  %1762 = vmatpush3.bf16.msra.mxu0 %v1270_v45  ;;  %v1469_v2 = vsel %vm740_vm3, %v1468_v46, 0  ;;  %v1460_v29 = vsel %vm737_vm2, %v1458_v28, %v1452_v18 }
 0x137   : > { %1735 = vmatprep.subr.bf16.mxu1 %v1893_v58  ;;  %1775 = vmatprep.subr.bf16.mxu0 %v1893_v58  ;;  %v1462_v4 = vsel %vm740_vm3, %v1460_v29, %v2287_v26 }
 0x139   : > { %1724 = vmatmul.mubr.msk.bf16.vlgmr.msra.gmra.mxu1 %vm754_vm4, %v2184_v3  ;;  %1764 = vmatmul.mubr.msk.bf16.vlgmr.msra.gmra.mxu0 %vm754_vm4, %v2184_v3 }
 0x13a   : > { %1736 = vmatpush3.bf16.msra.mxu1 %v1082_v61  ;;  %1776 = vmatpush3.bf16.msra.mxu0 %v1404_v23 }
 0x13b   : > { %1737 = vmatprep.subr.bf16.mxu1 %v1893_v58  ;;  %1777 = vmatprep.subr.bf16.mxu0 %v1893_v58 }
 0x13c   : > { %1739 = vmatprep.mubr.msk.bf16.mxu1 %vm1894_vm0, %v1893_v58  ;;  %1779 = vmatprep.mubr.msk.bf16.mxu0 %vm1894_vm0, %v1893_v58 }
 0x13e   : > { %1738 = vmatpush3.bf16.msra.mxu1 %v1075_v59  ;;  %1778 = vmatpush3.bf16.msra.mxu0 %v1397_v33 }
 0x13f   : > { %1751 = vmatprep.subr.bf16.mxu1 %v1893_v58 }
 0x141   : > { %1740 = vmatmul.mubr.msk.bf16.vlgmr.msra.gmra.mxu1 %vm754_vm4, %v2184_v3  ;;  %1780 = vmatmul.mubr.msk.bf16.vlgmr.msra.gmra.mxu0 %vm754_vm4, %v2184_v3 }
 0x142   : > { %1752 = vmatpush3.bf16.msra.mxu1 %v1209_v5  ;;  %1755 = vmatprep.mubr.msk.bf16.mxu1 %vm1894_vm0, %v1893_v58 }
 0x143   : > { %1753 = vmatprep.subr.bf16.mxu1 %v1893_v58 }
 0x146   : > { %1754 = vmatpush3.bf16.msra.mxu1 %v1202_v8 }
 0x147   : > { %1767 = vmatprep.subr.bf16.mxu1 %v1893_v58 }
 0x149   : > { %1756 = vmatmul.mubr.msk.bf16.vlgmr.msra.gmra.mxu1 %vm754_vm4, %v2184_v3 }
 0x14a   : > { %1768 = vmatpush3.bf16.msra.mxu1 %v1342_v9  ;;  %1771 = vmatprep.mubr.msk.bf16.mxu1 %vm1894_vm0, %v1893_v58 }
 0x14b   : > { %1769 = vmatprep.subr.bf16.mxu1 %v1893_v58 }
 0x14e   : > { %1770 = vmatpush3.bf16.msra.mxu1 %v1335_v17 }
 0x14f   : > { %1783 = vmatprep.subr.bf16.mxu1 %v1893_v58 }
 0x151   : > { %1772 = vmatmul.mubr.msk.bf16.vlgmr.msra.gmra.mxu1 %vm754_vm4, %v2184_v3 }
 0x152   : > { %1784 = vmatpush3.bf16.msra.mxu1 %v1469_v2  ;;  %1787 = vmatprep.mubr.msk.bf16.mxu1 %vm1894_vm0, %v1893_v58 }
 0x153   : > { %1785 = vmatprep.subr.bf16.mxu1 %v1893_v58 }
 0x156   : > { %1786 = vmatpush3.bf16.msra.mxu1 %v1462_v4 }
 0x159   : > { %1788 = vmatmul.mubr.msk.bf16.vlgmr.msra.gmra.mxu1 %vm754_vm4, %v2184_v3 }
 0x1e1   : > { %v794_v20 = vpop.f32.mrf.mxu1 }
 0x1e2   : > { %v795_v30 = vadd.f32 %v794_v20, %v2411_v37 }
 0x1e3   : > { %v1701_v31 = vpop.f32.mrf.mxu1 }
 0x1e4   : > { %v800_v58 = vpack.c.bf16 %v795_v30, %v795_v30 }
 0x1e5   : > { %v797_v3 = vpop.f32.mrf.mxu1 }
 0x1e6   : > { %801 = vst [vmem:[%s2417_s5] sm:$0xf] %v800_v58 }
 0x1e7   : > { %v1702_v26 = vpop.f32.mrf.mxu1 }
 0x1e9   : > { %v858_v34 = vpop.f32.mrf.mxu1  ;;  %v1053_v36 = vpop.f32.mrf.mxu0 }
 0x1ea   : > { %v859_v38 = vadd.f32 %v858_v34, %v2411_v37  ;;  %v1054_v39 = vadd.f32 %v1053_v36, %v2411_v37 }
 0x1eb   : > { %v1709_v42 = vpop.f32.mrf.mxu1  ;;  %v1733_v44 = vpop.f32.mrf.mxu0 }
 0x1ec   : > { %v864_v45 = vpack.c.bf16 %v859_v38, %v859_v38  ;;  %v1059_v50 = vpack.c.bf16 %v1054_v39, %v1054_v39 }
 0x1ed   : > { %v861_v52 = vpop.f32.mrf.mxu1  ;;  %v1056_v53 = vpop.f32.mrf.mxu0 }
 0x1ee   : > { %1631 = vst [vmem:[%s2417_s5 + $0x4] sm:$0xf] %v864_v45  ;;  %1638 = vst [vmem:[%s2417_s5 + $0x10] sm:$0xf] %v1059_v50 }
 0x1ef   : > { %v1710_v55 = vpop.f32.mrf.mxu1  ;;  %v1734_v57 = vpop.f32.mrf.mxu0 }
 0x1f1   : > { %v920_v60 = vpop.f32.mrf.mxu1  ;;  %v1180_v23 = vpop.f32.mrf.mxu0 }
 0x1f2   : > { %v921_v41 = vadd.f32 %v920_v60, %v2411_v37  ;;  %v1181_v61 = vadd.f32 %v1180_v23, %v2411_v37 }
 0x1f3   : > { %v1717_v32 = vpop.f32.mrf.mxu1  ;;  %v1749_v51 = vpop.f32.mrf.mxu0 }
 0x1f4   : > { %v926_v62 = vpack.c.bf16 %v921_v41, %v921_v41  ;;  %v1186_v56 = vpack.c.bf16 %v1181_v61, %v1181_v61 }
 0x1f5   : > { %v923_v63 = vpop.f32.mrf.mxu1  ;;  %v1183_v0 = vpop.f32.mrf.mxu0 }
 0x1f6   : > { %1633 = vst [vmem:[%s2417_s5 + $0x8] sm:$0xf] %v926_v62  ;;  %1643 = vst [vmem:[%s2417_s5 + $0x18] sm:$0xf] %v1186_v56 }
 0x1f7   : > { %v1718_v1 = vpop.f32.mrf.mxu1  ;;  %v1750_v21 = vpop.f32.mrf.mxu0 }
 0x1f9   : > { %v985_v59 = vpop.f32.mrf.mxu1  ;;  %v1313_v33 = vpop.f32.mrf.mxu0 }
 0x1fa   : > { %v986_v15 = vadd.f32 %v985_v59, %v2411_v37  ;;  %v1314_v43 = vadd.f32 %v1313_v33, %v2411_v37 }
 0x1fb   : > { %v1725_v24 = vpop.f32.mrf.mxu1  ;;  %v1765_v6 = vpop.f32.mrf.mxu0 }
 0x1fc   : > { %v991_v10 = vpack.c.bf16 %v986_v15, %v986_v15  ;;  %v1319_v5 = vpack.c.bf16 %v1314_v43, %v1314_v43 }
 0x1fd   : > { %v988_v49 = vpop.f32.mrf.mxu1  ;;  %v1316_v7 = vpop.f32.mrf.mxu0 }
 0x1fe   : > { %1636 = vst [vmem:[%s2417_s5 + $0xc] sm:$0xf] %v991_v10  ;;  %1648 = vst [vmem:[%s2417_s5 + $0x20] sm:$0xf] %v1319_v5 }
 0x1ff   : > { %v1726_v47 = vpop.f32.mrf.mxu1  ;;  %v1766_v13 = vpop.f32.mrf.mxu0 }
 0x201   : > { %v1118_v8 = vpop.f32.mrf.mxu1  ;;  %v1440_v12 = vpop.f32.mrf.mxu0 }
 0x202   : > { %v1119_v27 = vadd.f32 %v1118_v8, %v2411_v37  ;;  %v1441_v14 = vadd.f32 %v1440_v12, %v2411_v37 }
 0x203   : > { %v1741_v16 = vpop.f32.mrf.mxu1  ;;  %v1781_v19 = vpop.f32.mrf.mxu0 }
 0x204   : > { %v1124_v22 = vpack.c.bf16 %v1119_v27, %v1119_v27  ;;  %v1446_v9 = vpack.c.bf16 %v1441_v14, %v1441_v14 }
 0x205   : > { %v1121_v40 = vpop.f32.mrf.mxu1  ;;  %v1443_v25 = vpop.f32.mrf.mxu0 }
 0x206   : > { %1641 = vst [vmem:[%s2417_s5 + $0x14] sm:$0xf] %v1124_v22  ;;  %1653 = vst [vmem:[%s2417_s5 + $0x28] sm:$0xf] %v1446_v9 }
 0x207   : > { %v1742_v48 = vpop.f32.mrf.mxu1  ;;  %v1782_v35 = vpop.f32.mrf.mxu0 }
 0x209   : > { %v1245_v54 = vpop.f32.mrf.mxu1 }
 0x20a   : > { %v1246_v11 = vadd.f32 %v1245_v54, %v2411_v37 }
 0x20b   : > { %v1757_v17 = vpop.f32.mrf.mxu1 }
 0x20c   : > { %v1251_v18 = vpack.c.bf16 %v1246_v11, %v1246_v11 }
 0x20d   : > { %v1248_v46 = vpop.f32.mrf.mxu1 }
 0x20e   : > { %1646 = vst [vmem:[%s2417_s5 + $0x1c] sm:$0xf] %v1251_v18 }
 0x20f   : > { %v1758_v28 = vpop.f32.mrf.mxu1 }
 0x211   : > { %v1378_v2 = vpop.f32.mrf.mxu1 }
 0x212   : > { %v1379_v29 = vadd.f32 %v1378_v2, %v2411_v37 }
 0x213   : > { %v1773_v4 = vpop.f32.mrf.mxu1 }
 0x214   : > { %v1384_v20 = vpack.c.bf16 %v1379_v29, %v1379_v29 }
 0x215   : > { %v1381_v30 = vpop.f32.mrf.mxu1 }
 0x216   : > { %1651 = vst [vmem:[%s2417_s5 + $0x24] sm:$0xf] %v1384_v20 }
 0x217   : > { %v1774_v31 = vpop.f32.mrf.mxu1 }
 0x219   : > { %v1505_v58 = vpop.f32.mrf.mxu1 }
 0x21a   : > { %v1506_v3 = vadd.f32 %v1505_v58, %v2411_v37 }
 0x21b   : > { %v1789_v26 = vpop.f32.mrf.mxu1 }
 0x21c   : > { %v1511_v34 = vpack.c.bf16 %v1506_v3, %v1506_v3 }
 0x21d   : > { %v1508_v36 = vpop.f32.mrf.mxu1 }
 0x21e   : > { %1656 = vst [vmem:[%s2417_s5 + $0x2c] sm:$0xf] %v1511_v34 }
 0x21f   : > { %v1790_v38 = vpop.f32.mrf.mxu1 }
 0x220 PF: > { %s14_s15 = sadd.s32 1, %s1890_s15  }
 0x221   : > { %p11_p5 = scmp.ge.s32.totalorder %s14_s15, 4  }
 0x223   :  { %13 = sbr.rel (!%p11_p5) target bundleno = 1 (0x1), region = 77 }

</bundles_post_ra>
